<compile_context>
chip_gen: v5e
topology: v5e:2x2
jax: 0.10.0
libtpu: 0.0.40
codegen_flags: <defaults>
</compile_context>

<pallas_src>
import math
import jax
import jax.numpy as jnp
from jax.experimental import pallas as pl
from jax.experimental.pallas import tpu as pltpu


def token_embed_kernel(x_ref, w_ref, o_ref, xcat_ref):
    # x_ref   : (L, C)            full sequence of this batch (DMA'd once per batch)
    # w_ref   : (3C, D_tile)      weight slab (changes only when d changes)
    # o_ref   : (L_tile, D_tile)  one output tile
    # xcat_ref: (L, 3C)           per-batch scratch, operand dtype, 3 circular taps
    d = pl.program_id(1)
    l = pl.program_id(2)
    L, C = x_ref.shape
    L_tile = o_ref.shape[0]

    # Build the fused-tap matrix once per batch (first grid step of the batch).
    @pl.when(jnp.logical_and(d == 0, l == 0))
    def _():
        x = x_ref[...]                                                       # (L, C) operand dtype
        # roll(x, s)[t] = x[(t - s) mod L]
        xcat_ref[:, 0:C]         = pltpu.roll(x, shift=1 % L, axis=0)        # x_{t-1}
        xcat_ref[:, C:2 * C]     = x                                         # x_t
        xcat_ref[:, 2 * C:3 * C] = pltpu.roll(x, shift=(L - 1) % L, axis=0)  # x_{t+1}

    start = pl.multiple_of(l * L_tile, L_tile)
    # Single fused matmul per output tile; operands already in MXU dtype,
    # accumulation in f32 on the MXU, store-cast to the output dtype.
    xt = xcat_ref[pl.ds(start, L_tile), :]                                   # (L_tile, 3C)
    o_ref[...] = jnp.dot(xt, w_ref[...],
                         preferred_element_type=jnp.float32).astype(o_ref.dtype)


def _pick_tile(n, max_tile):
    for c in (1024, 512, 256, 128, 64, 32, 16, 8):
        if c <= max_tile and c <= n and n % c == 0:
            return c
    return n  # fallback: single (full-extent) tile


def token_embedding(x, w, *, compute_dtype=None, out_dtype=None,
                    l_tile_max=1024, d_tile_max=1024, keep_padded=False,
                    vmem_budget_bytes=None):
    """x: (B, L, C), w: (3*c_in, d_model) flat tap-major weight -> (B, L, D)."""
    B, L, C = x.shape
    K3, D = w.shape
    assert K3 == 3 * C, "weight must have shape (3*c_in, d_model)"

    orig_dtype = x.dtype
    op_dtype = jnp.dtype(compute_dtype) if compute_dtype is not None else jnp.dtype(orig_dtype)
    out_dtype = jnp.dtype(out_dtype) if out_dtype is not None else jnp.dtype(orig_dtype)
    x = x.astype(op_dtype)
    w = w.astype(op_dtype)

    # Lane-dense output: pad D up to a multiple of 128 (unmasked full-lane stores).
    D_pad = -(-D // 128) * 128
    if D_pad != D:
        w = jnp.pad(w, ((0, 0), (0, D_pad - D)))
    # TODO(synk): if c_in itself grows large and is not 128-aligned, pad each tap
    # slab to ceil(C/128)*128 (with matching zero weight rows) for aligned builds.

    # ---------------- VMEM budgeting (explicit on every generation) ----------------
    if vmem_budget_bytes is None:
        try:
            phys = pltpu.get_tpu_info().vmem_capacity_bytes
        except Exception:
            phys = 64 << 20  # v7x per-TC physical VMEM; safe lower bound everywhere
        vmem_budget_bytes = int(phys * 0.75)

    sz_op = op_dtype.itemsize
    sz_out = out_dtype.itemsize

    def vmem_estimate(lt, dt):
        return (2 * L * C * sz_op              # resident x block (double-buffered)
                + 2 * 3 * C * dt * sz_op       # weight slab (double-buffered)
                + 2 * lt * dt * sz_out         # output tile (double-buffered)
                + L * 3 * C * sz_op)           # xcat scratch (operand dtype)

    L_tile = _pick_tile(L, min(l_tile_max, L))
    D_tile = _pick_tile(D_pad, min(d_tile_max, D_pad))
    # Shrink tiles until the estimate fits the budget (D first: it also shrinks
    # the per-step weight slab). D_tile stays >= 128 to keep lane-dense stores.
    while vmem_estimate(L_tile, D_tile) > vmem_budget_bytes:
        if D_tile > 128:
            D_tile = _pick_tile(D_pad, D_tile // 2)
        elif L_tile > 8:
            new_lt = _pick_tile(L, max(L_tile // 2, 8))
            if new_lt >= L_tile:
                break
            L_tile = new_lt
        else:
            break

    vmem_limit_bytes = int(min(vmem_budget_bytes,
                               max(2 * vmem_estimate(L_tile, D_tile), 32 << 20)))

    # Grid order (B, D, L): L innermost so the weight block index (which depends
    # only on d) stays constant across the inner sweep -> the full weight is
    # DMA'd at most once per batch (exactly once total when D_pad == D_tile,
    # since then its index map is constant).
    grid = (B, D_pad // D_tile, L // L_tile)

    compiler_params = pltpu.CompilerParams(
        # Batch axis shards across TensorCores (megacore / v7x 2 TCs). The D and
        # L axes stay sequential because the xcat scratch is built at the first
        # (d==0, l==0) step of each batch (see TODO above for lifting this).
        dimension_semantics=("parallel", "arbitrary", "arbitrary"),
        vmem_limit_bytes=vmem_limit_bytes,
    )

    cost_estimate = pl.CostEstimate(
        flops=2 * B * L * (3 * C) * D_pad,
        transcendentals=0,
        bytes_accessed=(B * L * C * sz_op            # x read (once per batch)
                        + B * 3 * C * D_pad * sz_op  # weight read (<= once per batch)
                        + B * L * D_pad * sz_out),   # output write
    )

    out = pl.pallas_call(
        token_embed_kernel,
        out_shape=jax.ShapeDtypeStruct((B, L, D_pad), out_dtype),
        grid=grid,
        in_specs=[
            pl.BlockSpec((None, L, C), lambda b, d, l: (b, 0, 0)),   # x: once per batch
            pl.BlockSpec((3 * C, D_tile), lambda b, d, l: (0, d)),   # weight: d-only index
        ],
        out_specs=pl.BlockSpec((None, L_tile, D_tile), lambda b, d, l: (b, l, d)),
        scratch_shapes=[pltpu.VMEM((L, 3 * C), op_dtype)],
        compiler_params=compiler_params,
        cost_estimate=cost_estimate,
    )(x, w)

    if D_pad != D and not keep_padded:
        # Caller can pass keep_padded=True to avoid this extra XLA copy and
        # consume the lane-padded layout directly.
        out = out[:, :, :D]
    return out


def make_weight(key, c_in, d_model):
    """Deterministic kaiming_normal_(mode='fan_in', nonlinearity='leaky_relu')
    init of the Conv1d weight (d_model, c_in, 3), returned flat as (3*c_in, d_model)."""
    a = 0.01  # torch default negative_slope for leaky_relu
    gain = math.sqrt(2.0 / (1.0 + a * a))
    fan_in = c_in * 3
    std = gain / math.sqrt(fan_in)
    w_torch = std * jax.random.normal(key, (d_model, c_in, 3), dtype=jnp.float32)
    # (d_model, c_in, 3) -> (3, c_in, d_model) -> (3*c_in, d_model)
    return jnp.transpose(w_torch, (2, 1, 0)).reshape(3 * c_in, d_model)


def reference(x, w2d):
    """Independent pure-JAX reference: explicit circular pad + valid conv."""
    B, L, C = x.shape
    w3 = w2d.reshape(3, C, -1)                                      # (W, I, O)
    xp = jnp.concatenate([x[:, -1:, :], x, x[:, :1, :]], axis=1)    # (B, L+2, C)
    return jax.lax.conv_general_dilated(
        xp, w3, window_strides=(1,), padding="VALID",
        dimension_numbers=("NWC", "WIO", "NWC"))


if __name__ == "__main__":
    B, L, C, D = 2, 16, 4, 32
    key = jax.random.PRNGKey(0)
    kx, kw = jax.random.split(key)
    x = jax.random.normal(kx, (B, L, C), dtype=jnp.float32)
    w = make_weight(kw, C, D)                         # (3C, D)

    out = jax.block_until_ready(token_embedding(x, w))
    ref = jax.block_until_ready(reference(x, w))
    assert out.shape == (B, L, D)
    assert out.dtype == jnp.float32
    assert jnp.allclose(out, ref, atol=1e-4, rtol=1e-4), "f32 mismatch vs reference"

    # bf16 MXU operand path (f32 accumulation, f32 output): error limited to
    # operand rounding.
    out_bf16 = jax.block_until_ready(
        token_embedding(x, w, compute_dtype=jnp.bfloat16))
    assert out_bf16.dtype == jnp.float32
    assert jnp.allclose(out_bf16, ref, atol=1e-1, rtol=1e-1), \
        "bf16 mismatch vs reference"

    print("KERNEL_OK")
</pallas_src>

<mosaic_0001>
module attributes {stable_mosaic.version = 11 : i64} {
  func.func @token_embed_kernel(%arg0: i32, %arg1: i32, %arg2: i32, %arg3: memref<1x16x4xf32, #tpu.memory_space<vmem>>, %arg4: memref<12x128xf32, #tpu.memory_space<vmem>>, %arg5: memref<1x16x128xf32, #tpu.memory_space<vmem>>, %arg6: memref<16x12xf32, #tpu.memory_space<vmem>>) attributes {dimension_semantics = [#tpu.dimension_semantics<parallel>, #tpu.dimension_semantics<arbitrary>, #tpu.dimension_semantics<arbitrary>], iteration_bounds = array<i64: 2, 1, 1>, scalar_prefetch = 0 : i64, scratch_operands = 1 : i64, tpu.core_type = #tpu.core_type<tc>, window_params = [{transform_indices = @transform_0, window_bounds = array<i64: 1, 16, 4>}, {transform_indices = @transform_1, window_bounds = array<i64: 12, 128>}, {transform_indices = @transform_2, window_bounds = array<i64: 1, 16, 128>}]} {
    %c0_i32 = arith.constant 0 : i32
    %0 = arith.cmpi eq, %arg1, %c0_i32 : i32
    %c0_i32_0 = arith.constant 0 : i32
    %1 = arith.cmpi eq, %arg2, %c0_i32_0 : i32
    %2 = arith.andi %0, %1 : i1
    %3 = arith.extui %2 : i1 to i32
    %c0_i32_1 = arith.constant 0 : i32
    %4 = arith.cmpi ne, %3, %c0_i32_1 : i32
    scf.if %4 {
      %c0_7 = arith.constant 0 : index
      %c0_8 = arith.constant 0 : index
      %c0_9 = arith.constant 0 : index
      %14 = vector.load %arg3[%c0_7, %c0_8, %c0_9] : memref<1x16x4xf32, #tpu.memory_space<vmem>>, vector<1x16x4xf32>
      %15 = vector.shape_cast %14 : vector<1x16x4xf32> to vector<16x4xf32>
      %c1_i32 = arith.constant 1 : i32
      %16 = tpu.dynamic_rotate %15 by %c1_i32 dim 0 : vector<16x4xf32>, i32 -> vector<16x4xf32>
      %c0_10 = arith.constant 0 : index
      %c0_11 = arith.constant 0 : index
      %17 = vector.load %arg6[%c0_10, %c0_11] : memref<16x12xf32, #tpu.memory_space<vmem>>, vector<16x4xf32>
      tpu.vector_store %arg6[%c0_10, %c0_11], %16 {strides = array<i32>} : memref<16x12xf32, #tpu.memory_space<vmem>>, vector<16x4xf32>,
      %c0_12 = arith.constant 0 : index
      %c4 = arith.constant 4 : index
      %18 = vector.load %arg6[%c0_12, %c4] : memref<16x12xf32, #tpu.memory_space<vmem>>, vector<16x4xf32>
      tpu.vector_store %arg6[%c0_12, %c4], %15 {strides = array<i32>} : memref<16x12xf32, #tpu.memory_space<vmem>>, vector<16x4xf32>,
      %c15_i32 = arith.constant 15 : i32
      %19 = tpu.dynamic_rotate %15 by %c15_i32 dim 0 : vector<16x4xf32>, i32 -> vector<16x4xf32>
      %c0_13 = arith.constant 0 : index
      %c8 = arith.constant 8 : index
      %20 = vector.load %arg6[%c0_13, %c8] : memref<16x12xf32, #tpu.memory_space<vmem>>, vector<16x4xf32>
      tpu.vector_store %arg6[%c0_13, %c8], %19 {strides = array<i32>} : memref<16x12xf32, #tpu.memory_space<vmem>>, vector<16x4xf32>,
    } else {
    }
    %c16_i32 = arith.constant 16 : i32
    %5 = arith.muli %arg2, %c16_i32 : i32
    %6 = tpu.assume_multiple %5, 16 : i32
    %7 = arith.index_cast %6 : i32 to index
    %c0 = arith.constant 0 : index
    %8 = vector.load %arg6[%7, %c0] : memref<16x12xf32, #tpu.memory_space<vmem>>, vector<16x12xf32>
    %c0_2 = arith.constant 0 : index
    %c0_3 = arith.constant 0 : index
    %9 = vector.load %arg4[%c0_2, %c0_3] : memref<12x128xf32, #tpu.memory_space<vmem>>, vector<12x128xf32>
    %cst = arith.constant dense<0.000000e+00> : vector<16x128xf32>
    %10 = tpu.matmul %8, %9, %cst {dimension_numbers = #tpu.dot_dimension_numbers<[1], [0], [0], [1], [0, 0, 1, 1], [], []>} : vector<16x12xf32>, vector<12x128xf32>, vector<16x128xf32> -> vector<16x128xf32>
    %c0_4 = arith.constant 0 : index
    %c0_5 = arith.constant 0 : index
    %c0_6 = arith.constant 0 : index
    %11 = vector.load %arg5[%c0_4, %c0_5, %c0_6] : memref<1x16x128xf32, #tpu.memory_space<vmem>>, vector<1x16x128xf32>
    %12 = vector.shape_cast %11 : vector<1x16x128xf32> to vector<16x128xf32>
    %13 = vector.shape_cast %10 : vector<16x128xf32> to vector<1x16x128xf32>
    tpu.vector_store %arg5[%c0_4, %c0_5, %c0_6], %13 {strides = array<i32>} : memref<1x16x128xf32, #tpu.memory_space<vmem>>, vector<1x16x128xf32>,
    return
  }
  func.func @transform_0(%arg0: i32, %arg1: i32, %arg2: i32) -> (i32, i32, i32) {
    %c0_i32 = arith.constant 0 : i32
    %c0_i32_0 = arith.constant 0 : i32
    %c0_i32_1 = arith.constant 0 : i32
    return %arg0, %c0_i32, %c0_i32_0 : i32, i32, i32
  }
  func.func @transform_1(%arg0: i32, %arg1: i32, %arg2: i32) -> (i32, i32) {
    %c0_i32 = arith.constant 0 : i32
    %c0_i32_0 = arith.constant 0 : i32
    return %c0_i32, %arg1 : i32, i32
  }
  func.func @transform_2(%arg0: i32, %arg1: i32, %arg2: i32) -> (i32, i32, i32) {
    %c0_i32 = arith.constant 0 : i32
    return %arg0, %arg2, %arg1 : i32, i32, i32
  }
}

</mosaic_0001>

<bundles_post_ra>
// kernel: tpu_custom_call.1
= control target key start
LH: loop header
LB: loop body
LE: loop exit
PB: predicated region body
PF: predicated region fallthrough
CT: control target
= control target key end

     0   :  { %7 = vsyncpa [#allocation4], 0  ;;  %s666_s0 = inlined_call_operand.vmem [shape: f32[2,16,4], index: 0, kind: input, shape index: {}]   ;;  %s667_s1 = inlined_call_operand.vmem [shape: f32[12,128], index: 1, kind: input, shape index: {}]   ;;  %s668_s2 = inlined_call_operand.hbm [shape: f32[2,16,128], index: 2, kind: output, shape index: {}]  }
   0x1   :  { %9 = vsyncpa [#allocation4 + $0x1], 0  ;;  %s560_s9 = smov 0   ;;  %s562_s10 = smov 0  }
   0x2   :  { %s564_s11 = smov 0   ;;  %s566_s12 = smov 0  }
   0x3   :  { %s568_s13 = smov 0   ;;  %s570_s14 = smov 0  }
   0x4 LB: > { %s383_s15 = sadd.s32 4294967295, %s540_s14   ;;  %s384_s16 = sadd.s32 4294967294, %s540_s14   ;;  %s540_s14 = sphi %s570_s14, %s15_s14   ;;  %s536_s13 = sphi %s568_s13, %s675_s13   ;;  %s532_s12 = sphi %s566_s12, %s674_s12   ;;  %s528_s11 = sphi %s564_s11, %s673_s11   ;;  %s524_s10 = sphi %s562_s10, %s672_s10   ;;  %s520_s9 = sphi %s560_s9, %s671_s9  }
   0x5   : > { %s34_s17 = sadd.s32 1, %s536_s13  ;;  %s97_s18 = sadd.s32 1, %s528_s11 }
   0x6   : > { %p36_p0 = scmp.ge.s32.totalorder %s34_s17, 2  ;;  %p107_p1 = scmp.ne.s32.totalorder %s528_s11, %s524_s10 }
   0x7   : > { %p108_p2 = scmp.eq.s32.totalorder %s383_s15, 1  ;;  %p113_p3 = scmp.ne.s32.totalorder %s524_s10, %s520_s9 }
   0x8   : > { %s677_s17 = smov (%p36_p0, %s34_s17), 0  ;;  %p114_p5 = scmp.eq.s32.totalorder %s384_s16, 1 }
   0x9   : > { %p600_p4 = por %p108_p2, %p107_p1  ;;  %s90_s20 = ssub.s32 %s536_s13, %s677_s17 }
   0xa   : > { %p388_p6 = scmp.ge.s32.totalorder %s540_s14, 1  ;;  %p95_p7 = scmp.eq.s32.totalorder %s90_s20, 0 }
   0xb   : > { %p607_p8 = por %p114_p5, %p113_p3  ;;  %p147_p9 = scmp.lt.s32.totalorder %s540_s14, 3 }
   0xc   : > { %s613_s22 = scalar_select %p95_p7, %s528_s11, %s97_s18  }
   0xd   : > { %p148_p10 = pnand %p388_p6, %p147_p9 }
   0xe   : > { %p173_p11 = scmp.lt.s32.totalorder (!%p148_p10), %s532_s12, 1  ;;  %s542_s28 = smov (!%p148_p10), 4  }
   0xf   : > { %151 = sbr.rel (%p148_p10) target bundleno = 289 (0x121), region = 28  ;;  %s543_s29 = smov (!%p148_p10), 8  }
  0x10   : > { %s170_s6 = sand.u32 (!%p148_p10), 1, %s524_s10   ;;  %s401_s8 = sshll.u32 (!%p148_p10), %s532_s12, 4 }
  0x11   : > { %s389_s7 = sshll.u32 (!%p148_p10), %s170_s6, 4  ;;  %s285_s20 = scalar_lea.hbm (!%p148_p10), %s668_s2, %s401_s8 }
  0x12   : > { %s172_s15 = scalar_lea.vmem (!%p148_p10), [#allocation3], %s389_s7  ;;  %s271_s25 = scalar_lea.sflag (!%p148_p10), [#allocation4], %s170_s6 }
  0x13   : > { %s482_s30 = scalar_lea.hbm (!%p148_p10), %s668_s2, 32 }
  0x14   : > { %v193_v0 = vlaneseq  ;;  %s174_s23 = scalar_select %p173_p11, %s532_s12, 1  ;;  %vm198_vm2 = vcmask 31744   ;;  %v233_v11 = vld [vmem:[%s667_s1 + $0x8] sm:$0xf]  ;;  %vm241_vm3 = vcmask 1043456   ;;  %v232_v13 = vld [vmem:[%s667_s1] sm:$0xff] }
  0x15   : > { %392 = vmatpush.msk.msra.mxu0 %vm241_vm3, %v233_v11  ;;  %402 = vmatpush.msk.msra.mxu1 %vm241_vm3, %v233_v11  ;;  %vm209_vm4 = vcmask 64544   ;;  %vm225_vm5 = vcmask 97344   ;;  %vm234_vm6 = vcmask 97280  }
  0x16   : > { %v194_v1 = vshrl.u32 %v193_v0, 7  ;;  %s400_s24 = sshll.u32 %s174_s23, 4  ;;  %s286_s23 = sshll.u32 %s172_s15, 4  ;;  %s287_s23 = int_to_ptr.vmem [resolvable:$true] %s286_s23 }
  0x17   : > { %s177_s27 = scalar_lea.vmem %s666_s0, %s400_s24  ;;  %260 = vmatpush.msra.mxu0 %v232_v13  ;;  %403 = vmatpush.msra.mxu1 %v232_v13  ;;  %s288_s24 = sshll.u32 %s285_s20, 4  ;;  %s289_s24 = int_to_ptr.hbm [resolvable:$true] %s288_s24 }
  0x18   : > { %v189_v2 = vld [vmem:[%s177_s27] sm:$0xff]  ;;  %v190_v3 = vld [vmem:[%s177_s27 + $0x8] sm:$0xff]  ;;  %vm214_vm0 = vcmp.lt.s32.totalorder %v194_v1, 7  ;;  %vm195_vm1 = vcmp.lt.s32.totalorder %v194_v1, 1  ;;  %s476_s26 = sshra.s32 %s289_s24, 4  ;;  %s477_s26 = int_to_ptr.hbm [resolvable:$true] %s476_s26 }
  0x19   : > { %203 = vrot.lane.b32.xlu0 %v189_v2, %s542_s28  ;;  %v212_v4 = vrot.slane %v189_v2, 1  ;;  %v213_v5 = vrot.slane %v190_v3, 1  ;;  %v192_v8 = vrot.slane %v190_v3, 7  ;;  %v191_v9 = vrot.slane %v189_v2, 7  ;;  %s478_s27 = scalar_lea.hbm %s477_s26, 16  ;;  %p483_p1 = scmp.lt.s32.totalorder %s477_s26, %s668_s2 }
  0x1a   : > { %p479_p12 = scmp.ne.s32.totalorder %s477_s26, %s478_s27  ;;  %p484_p2 = scmp.lt.s32.totalorder %s482_s30, %s478_s27 }
  0x1b   : > { %v215_v6 = vsel %vm214_vm0, %v212_v4, %v213_v5  ;;  %v216_v7 = vsel %vm214_vm0, %v213_v5, %v212_v4  ;;  %v197_v10 = vsel %vm195_vm1, %v192_v8, %v191_v9  ;;  %v196_v12 = vsel %vm195_vm1, %v191_v9, %v192_v8 }
  0x1c   : > { %219 = vrot.lane.b32.xlu1 %v215_v6, %s543_s29  ;;  %199 = vst.msk [vmem:[#allocation2] sm:$0xff] %vm198_vm2, %v197_v10  ;;  %p480_p13 = pnand %p479_p12, %p600_p4  ;;  %p485_p3 = por %p484_p2, %p483_p1 }
  0x1d   : > { %200 = vst.msk [vmem:[#allocation2 + $0x8] sm:$0xff] %vm198_vm2, %v196_v12 }
  0x1e   : > { %p481_p0 = pneg %p480_p13 }
  0x20   : > { %p486_p5 = pnand %p485_p3, %p481_p0 }
  0x21   : > { %205 = vrot.lane.b32.xlu0 %v190_v3, %s542_s28 }
  0x24   : > { %221 = vrot.lane.b32.xlu1 %v216_v7, %s543_s29 }
  0x8b   : > { %v204_v14 = vpop.permute.xlu0 %203 }
  0x8c   : > { %210 = vst.msk [vmem:[#allocation2] sm:$0xff] %vm209_vm4, %v204_v14 }
  0x8e   : > { %v220_v15 = vpop.permute.xlu1 %219 }
  0x8f   : > { %226 = vst.msk [vmem:[#allocation2] sm:$0xff] %vm225_vm5, %v220_v15 }
  0x93   : > { %v206_v16 = vpop.permute.xlu0 %205 }
  0x94   : > { %211 = vst.msk [vmem:[#allocation2 + $0x8] sm:$0xff] %vm209_vm4, %v206_v16 }
  0x96   : > { %v222_v17 = vpop.permute.xlu1 %221  ;;  %v230_v18 = vld [vmem:[#allocation2] sm:$0xff] }
  0x97   : > { %227 = vst.msk [vmem:[#allocation2 + $0x8] sm:$0xff] %vm225_vm5, %v222_v17  ;;  %393 = vmatmul.msk.f32.vlgmr.msra.gmra.mxu0 %vm234_vm6, %v230_v18 }
  0x9e   : > { %v231_v19 = vld [vmem:[#allocation2 + $0x8] sm:$0xff] }
  0x9f   : > { %394 = vmatmul.msk.f32.vlgmr.msra.gmra.mxu1 %vm234_vm6, %v231_v19 }
 0x114   : > { %v262_v20 = vpop.f32.mrf.mxu0 }
 0x115   : > { %268 = vst [vmem:[%s172_s15] sm:$0xff] %v262_v20 }
 0x11c   : > { %v265_v21 = vpop.f32.mrf.mxu1 }
 0x11d   : > { %269 = vst [vmem:[%s172_s15 + $0x8] sm:$0xff] %v265_v21 }
 0x11e   : > { %489 = shalt.err (!%p486_p5)
}
 0x11f   : > { %s544_s5 = smov 128  }
 0x120   : > { %404 = dma.vmem_to_hbm [thread:$0]  (%p600_p4), %s287_s23, 256, %s289_s24, %s271_s25, %s544_s5, %s544_s5, %s543_s29  }
 0x121 PF: > { %p410_p6 = scmp.ge.s32.totalorder %s540_s14, 2  ;;  %s303_s6 = sand.u32 1, %s520_s9  }
 0x122   : > { %s304_s7 = scalar_lea.sflag [#allocation4], %s303_s6 }
 0x123   : > { %p407_p7 = pnand %p410_p6, %p607_p8 }
 0x125   : > { %p408_p9 = pneg %p407_p7 }
 0x127   : > { %515 = dma.done.wait (%p408_p9), %s304_s7, 256  }
 0x128   : > { %517 = vsyncadd (%p408_p9), %s304_s7, 4294967040  ;;  %s15_s14 = sadd.s32 1, %s540_s14   ;;  %s671_s9 = smov %s524_s10 }
 0x129   : > { %p12_p10 = scmp.ge.s32.totalorder %s15_s14, 4   ;;  %s672_s10 = smov %s528_s11 }
 0x12a   : > { %s673_s11 = smov %s613_s22  ;;  %s674_s12 = smov %s536_s13 }
 0x12b   : > { %s675_s13 = smov %s677_s17  ;;  %14 = sbr.rel (!%p12_p10) target bundleno = 4 (0x4), region = 71 }
 0x130   :  { %310 = vsyncpa [#allocation4], 1 }
 0x131   :  { %312 = vsyncpa [#allocation4 + $0x1], 1 }

</bundles_post_ra>
